<compile_context>
chip_gen: v6e
topology: v6e:2x2x1
jax: 0.10.0
libtpu: 0.0.40
codegen_flags: <defaults>
</compile_context>

<pallas_src>
import jax
import jax.numpy as jnp
from jax.experimental import pallas as pl
from jax.experimental.pallas import tpu as pltpu


# ---------------------------------------------------------------------------
# Kernel
# ---------------------------------------------------------------------------
def _patch_embed_kernel(patches_ref, w_ref, pos_ref, o_ref):
    # patches_ref: (TM, K) bf16, TM = nb * P (whole images per tile)
    # w_ref:       (K, D)  bf16  (grid-invariant)
    # pos_ref:     (TM, D) f32   (grid-invariant, pre-tiled to TM rows)
    # o_ref:       (TM, D) out_dtype
    acc = jnp.dot(patches_ref[...], w_ref[...],
                  preferred_element_type=jnp.float32)   # MXU, f32 accumulate
    o_ref[...] = (acc + pos_ref[...]).astype(o_ref.dtype)   # flat +pos in f32


# ---------------------------------------------------------------------------
# Sizing helpers
# ---------------------------------------------------------------------------
def _round_up(x, m):
    return (x + m - 1) // m * m


def _pick_images_per_tile(batch, num_patches, target_rows):
    """Largest nb with nb | batch, nb*P <= target_rows, layout-friendly rows.

    Prefers (nb*P) % 16 == 0 (bf16 row packing), falls back to % 8, then to the
    full-M block (always layout-legal).  Caps nb at batch//2 so the parallel
    grid axis has >= 2 steps (both v7x TensorCores get work).
    """
    want = max(1, min(batch, max(1, target_rows // max(num_patches, 1))))
    if batch >= 2:
        want = max(1, min(want, batch // 2))
    for require in (16, 8):
        for nb in range(want, 0, -1):
            if batch % nb == 0 and (nb == batch or (nb * num_patches) % require == 0):
                return nb
    return batch  # full-M block


def _vmem_budget(tm, k, d, inv_bufs):
    """Per-step VMEM bytes, accounting for (8,128)/packing layout padding."""
    tm_bf16 = _round_up(tm, 16)   # bf16 rows pack 16 per sublane group
    tm_f32 = _round_up(tm, 8)
    k_lane = _round_up(k, 128)
    k_sub = _round_up(k, 16)
    d_lane = _round_up(d, 128)
    return (2 * tm_bf16 * k_lane * 2          # patches, bf16, double-buffered
            + inv_bufs * k_sub * d_lane * 2   # weight, bf16
            + inv_bufs * tm_f32 * d_lane * 4  # pos (pre-tiled), f32
            + 2 * tm_f32 * d_lane * 4)        # output, <=f32, double-buffered


def _vmem_cap_bytes():
    """Generation-aware VMEM cap: 75% of physical VMEM (v6e 96 MiB, v7x 48 MiB)."""
    try:
        return int(pltpu.get_tpu_info().vmem_capacity_bytes * 0.75)
    except Exception:
        return 48 * 1024 * 1024  # conservative default (safe on every gen)


# ---------------------------------------------------------------------------
# Feature probe + call builder
# ---------------------------------------------------------------------------
_FANCY_FEATURES_OK = None
_LAST_KERNEL_PATH = None  # "fused", "baseline", or "fallback-baseline" (inspectable)


def _fancy_features_available():
    """Construction-time probe for pipeline_mode=Buffered / allow_input_fusion."""
    global _FANCY_FEATURES_OK
    if _FANCY_FEATURES_OK is None:
        try:
            pl.BlockSpec((8, 128), lambda i: (0, 0), pipeline_mode=pl.Buffered(1))
            pltpu.CompilerParams(allow_input_fusion=[True, True, True])
            _FANCY_FEATURES_OK = True
        except (AttributeError, TypeError):
            _FANCY_FEATURES_OK = False
    return _FANCY_FEATURES_OK


def _build_call(m, tm, k, d, out_dtype, vmem_limit, *, fancy):
    grid = (m // tm,)

    def invariant_spec(shape):
        if fancy:
            # Constant index_map -> never re-fetched; single-buffer to save VMEM.
            return pl.BlockSpec(shape, lambda i: (0, 0),
                                pipeline_mode=pl.Buffered(1))
        return pl.BlockSpec(shape, lambda i: (0, 0))

    in_specs = [
        pl.BlockSpec((tm, k), lambda i: (i, 0)),   # patch tile (bf16)
        invariant_spec((k, d)),                    # weight (bf16)
        invariant_spec((tm, d)),                   # pre-tiled pos (f32)
    ]
    out_specs = pl.BlockSpec((tm, d), lambda i: (i, 0))

    compiler_params = pltpu.CompilerParams(
        dimension_semantics=("parallel",),
        vmem_limit_bytes=vmem_limit,
        # Let XLA fuse the patch-extraction transpose / bf16 casts / pos tile
        # into the pallas_call input DMA (avoids an HBM round trip under jit).
        allow_input_fusion=[True, True, True] if fancy else None,
    )

    return pl.pallas_call(
        _patch_embed_kernel,
        out_shape=jax.ShapeDtypeStruct((m, d), out_dtype),
        grid=grid,
        in_specs=in_specs,
        out_specs=out_specs,
        compiler_params=compiler_params,
    )


# ---------------------------------------------------------------------------
# Public wrapper
# ---------------------------------------------------------------------------
def patch_position_embedding(x, conv_weight, pos_embed, patch_size,
                             *, target_rows=2048, out_dtype=None):
    """x: (B, C, H, W); conv_weight: (D, C, ps, ps); pos_embed: (P, D).

    out_dtype defaults to x.dtype (f32 parity with the PyTorch module); pass
    jnp.bfloat16 to halve the output HBM stream if downstream allows it.
    """
    global _LAST_KERNEL_PATH
    B, C, H, W = x.shape
    D = conv_weight.shape[0]
    ps = patch_size
    assert H % ps == 0 and W % ps == 0, "image size must be divisible by patch size"
    gh, gw = H // ps, W // ps
    P = gh * gw
    K = C * ps * ps
    M = B * P
    assert pos_embed.shape == (P, D)
    out_dtype = x.dtype if out_dtype is None else out_dtype

    # Cast to bf16 BEFORE the 6-D transpose: halves bytes moved by patch prep.
    xb = x.astype(jnp.bfloat16)
    patches = xb.reshape(B, C, gh, ps, gw, ps)
    patches = patches.transpose(0, 2, 4, 1, 3, 5)   # (B, gh, gw, C, ps, ps)
    patches = patches.reshape(M, K)                 # (B*P, K) bf16, (c,kh,kw) order

    # Conv weight (D, C, ps, ps) -> (K, D), same (c, kh, kw) order; bf16 for MXU.
    w_mat = conv_weight.reshape(D, K).T.astype(jnp.bfloat16)
    pos = pos_embed.astype(jnp.float32)

    fancy = _fancy_features_available()
    inv_bufs = 1 if fancy else 2
    cap = _vmem_cap_bytes()

    # Pick TM = nb*P rows, then shrink until 2x (padded) budget fits the cap.
    nb = _pick_images_per_tile(B, P, target_rows)
    while nb > 1 and 2 * _vmem_budget(nb * P, K, D, inv_bufs) > cap:
        smaller = _pick_images_per_tile(B, P, (nb - 1) * P)
        if smaller >= nb:
            break
        nb = smaller
    tm = nb * P
    vmem_limit = min(cap, max(4 * 1024 * 1024,
                              2 * _vmem_budget(tm, K, D, inv_bufs)))

    # Pre-tile pos to (TM, D): flat add in the kernel, no per-step reshape.
    pos_tiled = jnp.tile(pos, (nb, 1))

    call = _build_call(M, tm, K, D, out_dtype, vmem_limit, fancy=fancy)
    try:
        out2d = call(patches, w_mat, pos_tiled)
        _LAST_KERNEL_PATH = "fused" if fancy else "baseline"
    except pltpu.LoweringException:
        if not fancy:
            raise
        # Explicit, narrow fallback: same tiling/precision, no Buffered(1) /
        # input fusion.  Path is recorded so a silent switch is detectable.
        out2d = _build_call(M, tm, K, D, out_dtype, vmem_limit,
                            fancy=False)(patches, w_mat, pos_tiled)
        _LAST_KERNEL_PATH = "fallback-baseline"

    return out2d.reshape(B, P, D)


# ---------------------------------------------------------------------------
# Demo / smoke test
# ---------------------------------------------------------------------------
if __name__ == "__main__":
    # Small shapes consistent with the module's forward (Conv2d in_channels=3,
    # stride=kernel=patch_size, bias=False, learned (P, D) positional table).
    # D=256 is a multiple of 128 so stores are lane-dense and the demo fills a
    # full 256-wide v6e/v7x MXU column block (production D=512 behaves alike).
    B, C, IMG, PS, D = 4, 3, 32, 8, 256
    P = (IMG // PS) ** 2          # 16 patches per image
    K = C * PS * PS               # 192

    key = jax.random.PRNGKey(0)
    kx, kw, kp = jax.random.split(key, 3)

    x = jax.random.normal(kx, (B, C, IMG, IMG), dtype=jnp.float32)
    conv_weight = jax.random.normal(kw, (D, C, PS, PS), dtype=jnp.float32) * 0.02
    pos_embed = (D ** -0.5) * jax.random.normal(kp, (P, D), dtype=jnp.float32)

    # Default target_rows; nb is capped at B//2 so the grid still has 2
    # parallel steps (32 rows per step) even at this tiny smoke-test size.
    out = patch_position_embedding(x, conv_weight, pos_embed, PS)
    out = jax.block_until_ready(out)
    assert out.shape == (B, P, D)

    # Pure-JAX reference on the same bf16-rounded MXU operands (f32 accumulate),
    # matching the kernel's precision choice.  Real-model parity vs. the true
    # f32 PyTorch Conv2d should be validated with an explicit tolerance.
    patches_ref = x.reshape(B, C, IMG // PS, PS, IMG // PS, PS)
    patches_ref = patches_ref.transpose(0, 2, 4, 1, 3, 5).reshape(B, P, K)
    p_bf = patches_ref.astype(jnp.bfloat16).astype(jnp.float32)
    w_bf = conv_weight.reshape(D, K).T.astype(jnp.bfloat16).astype(jnp.float32)
    ref = p_bf @ w_bf + pos_embed
    assert jnp.allclose(out, ref, atol=1e-3, rtol=1e-3), float(
        jnp.max(jnp.abs(out - ref)))

    print("KERNEL_OK")
</pallas_src>

<mosaic_0001>
module attributes {stable_mosaic.version = 11 : i64} {
  func.func @_patch_embed_kernel(%arg0: i32, %arg1: memref<32x192xbf16, #tpu.memory_space<vmem>>, %arg2: memref<192x256xbf16, #tpu.memory_space<vmem>>, %arg3: memref<32x256xf32, #tpu.memory_space<vmem>>, %arg4: memref<32x256xf32, #tpu.memory_space<vmem>>) attributes {dimension_semantics = [#tpu.dimension_semantics<parallel>], iteration_bounds = array<i64: 2>, scalar_prefetch = 0 : i64, scratch_operands = 0 : i64, tpu.core_type = #tpu.core_type<tc>, window_params = [{transform_indices = @transform_0, window_bounds = array<i64: 32, 192>}, {pipeline_mode = #tpu.pipeline_mode<synchronous>, transform_indices = @transform_1, window_bounds = array<i64: 192, 256>}, {pipeline_mode = #tpu.pipeline_mode<synchronous>, transform_indices = @transform_2, window_bounds = array<i64: 32, 256>}, {transform_indices = @transform_3, window_bounds = array<i64: 32, 256>}]} {
    %c0 = arith.constant 0 : index
    %c0_0 = arith.constant 0 : index
    %0 = vector.load %arg1[%c0, %c0_0] : memref<32x192xbf16, #tpu.memory_space<vmem>>, vector<32x192xbf16>
    %c0_1 = arith.constant 0 : index
    %c0_2 = arith.constant 0 : index
    %1 = vector.load %arg2[%c0_1, %c0_2] : memref<192x256xbf16, #tpu.memory_space<vmem>>, vector<192x256xbf16>
    %cst = arith.constant dense<0.000000e+00> : vector<32x256xf32>
    %2 = tpu.matmul %0, %1, %cst {dimension_numbers = #tpu.dot_dimension_numbers<[1], [0], [0], [1], [0, 0, 1, 1], [], []>} : vector<32x192xbf16>, vector<192x256xbf16>, vector<32x256xf32> -> vector<32x256xf32>
    %c0_3 = arith.constant 0 : index
    %c0_4 = arith.constant 0 : index
    %3 = vector.load %arg3[%c0_3, %c0_4] : memref<32x256xf32, #tpu.memory_space<vmem>>, vector<32x256xf32>
    %4 = arith.addf %2, %3 : vector<32x256xf32>
    %c0_5 = arith.constant 0 : index
    %c0_6 = arith.constant 0 : index
    %5 = vector.load %arg4[%c0_5, %c0_6] : memref<32x256xf32, #tpu.memory_space<vmem>>, vector<32x256xf32>
    tpu.vector_store %arg4[%c0_5, %c0_6], %4 {strides = array<i32>} : memref<32x256xf32, #tpu.memory_space<vmem>>, vector<32x256xf32>,
    return
  }
  func.func @transform_0(%arg0: i32) -> (i32, i32) {
    %c0_i32 = arith.constant 0 : i32
    %c0_i32_0 = arith.constant 0 : i32
    return %arg0, %c0_i32 : i32, i32
  }
  func.func @transform_1(%arg0: i32) -> (i32, i32) {
    %c0_i32 = arith.constant 0 : i32
    %c0_i32_0 = arith.constant 0 : i32
    %c0_i32_1 = arith.constant 0 : i32
    return %c0_i32, %c0_i32_0 : i32, i32
  }
  func.func @transform_2(%arg0: i32) -> (i32, i32) {
    %c0_i32 = arith.constant 0 : i32
    %c0_i32_0 = arith.constant 0 : i32
    %c0_i32_1 = arith.constant 0 : i32
    return %c0_i32, %c0_i32_0 : i32, i32
  }
  func.func @transform_3(%arg0: i32) -> (i32, i32) {
    %c0_i32 = arith.constant 0 : i32
    %c0_i32_0 = arith.constant 0 : i32
    return %arg0, %c0_i32 : i32, i32
  }
}

</mosaic_0001>

<bundles_post_ra>
// kernel: tpu_custom_call.1
= control target key start
LH: loop header
LB: loop body
LE: loop exit
PB: predicated region body
PF: predicated region fallthrough
CT: control target
= control target key end

     0   :  { %8 = vsyncpa [#allocation3], 0  ;;  %s1145_s0 = inlined_call_operand.hbm [shape: bf16[64,192], index: 0, kind: input, shape index: {}]   ;;  %s1146_s1 = inlined_call_operand.hbm [shape: bf16[192,256], index: 1, kind: input, shape index: {}]   ;;  %s1147_s2 = inlined_call_operand.hbm [shape: f32[32,256], index: 2, kind: input, shape index: {}]   ;;  %s1148_s3 = inlined_call_operand.hbm [shape: f32[64,256], index: 3, kind: output, shape index: {}]  }
   0x1   :  { %10 = vsyncpa [#allocation3 + $0x1], 0 }
   0x2   :  { %11 = vsyncpa [#allocation6], 0 }
   0x3   :  { %12 = vsyncpa [#allocation4], 0 }
   0x4   :  { %14 = vsyncpa [#allocation4 + $0x1], 0  ;;  %s944_s12 = smov 0   ;;  %s946_s13 = smov 0  }
   0x5   :  { %s948_s14 = smov 0   ;;  %s950_s15 = smov 0  }
   0x6 LB: > { %s965_s16 = sadd.s32 4294967295, %s912_s15   ;;  %s571_s17 = sadd.s32 4294967294, %s912_s15   ;;  %s912_s15 = sphi %s950_s15, %s1169_s15   ;;  %s908_s14 = sphi %s948_s14, %s1168_s14   ;;  %s904_s13 = sphi %s946_s13, %s1167_s13   ;;  %s900_s12 = sphi %s944_s12, %s1166_s12  }
   0x7   : > { %p40_p0 = scmp.ne.s32.totalorder %s904_s13, %s900_s12  ;;  %p1149_p1 = scmp.eq.s32.totalorder %s965_s16, 0 }
   0x8   : > { %p106_p2 = scmp.eq.s32.totalorder %s965_s16, 1  ;;  %p112_p3 = scmp.eq.s32.totalorder %s571_s17, 1 }
   0x9   : > { %p974_p4 = por %p1149_p1, %p40_p0  ;;  %p572_p5 = scmp.ge.s32.totalorder %s912_s15, 1 }
   0xa   : > { %p979_p6 = por %p112_p3, %p40_p0  ;;  %p119_p7 = scmp.lt.s32.totalorder %s912_s15, 3 }
   0xb   : > { %s1153_s18 = scalar_select %p974_p4, 1, 0 }
   0xc   : > { %s1154_s19 = scalar_select %p979_p6, 1, 0 }
   0xd   : > { %p984_p8 = pnand %p572_p5, %p119_p7  ;;  %s914_s21 = smov [#allocation5]  }
   0xe   : > { %s131_s22 = sshll.u32 %s914_s21, 4  ;;  %s915_s24 = smov [#allocation7]   ;;  %s132_s22 = int_to_ptr.vmem [resolvable:$true] %s131_s22 }
   0xf   : > { %s1155_s20 = scalar_select %p984_p8, 1, 0 }
  0x10   : > { %p661_p9 = pneg %p984_p8  ;;  %s144_s25 = sshll.u32 %s915_s24, 4  ;;  %s145_s25 = int_to_ptr.vmem [resolvable:$true] %s144_s25 }
  0x11   : > { %s775_s26 = scalar_lea.vmem %s132_s22, 3072  ;;  %p783_p5 = scmp.lt.s32.totalorder %s132_s22, %s132_s22 }
  0x12   : > { %p993_p11 = pnand %p661_p9, %p1149_p1  ;;  %p776_p13 = scmp.ne.s32.totalorder %s132_s22, %s775_s26 }
  0x13   : > { %p784_p7 = scmp.lt.s32.totalorder %s775_s26, %s775_s26 }
  0x14   : > { %p766_p12 = pneg %p993_p11 }
  0x15   : > { %p785_p10 = por %p784_p7, %p783_p5 }
  0x16   : > { %p778_p0 = pnand %p776_p13, %p766_p12 }
  0x18   : > { %p779_p3 = pneg %p778_p0 }
  0x1a   : > { %p786_p9 = pnand %p785_p10, %p779_p3 }
  0x1c   : > { %789 = shalt.err (!%p786_p9)
}
  0x1d   : > { %s916_s27 = smov 128   ;;  %s917_s28 = smov 8  }
  0x1e   : > { %664 = dma.hbm_to_vmem [thread:$0]  (!%p993_p11), %s1146_s1, 3072, %s132_s22, [#allocation6], %s916_s27, %s916_s27, %s917_s28  }
  0x1f   : > { %s801_s4 = scalar_lea.vmem %s145_s25, 1024  ;;  %p809_p10 = scmp.lt.s32.totalorder %s145_s25, %s145_s25 }
  0x20   : > { %p802_p13 = scmp.ne.s32.totalorder %s145_s25, %s801_s4  ;;  %p810_p3 = scmp.lt.s32.totalorder %s801_s4, %s801_s4 }
  0x22   : > { %p804_p0 = pnand %p802_p13, %p766_p12  ;;  %p811_p7 = por %p810_p3, %p809_p10 }
  0x24   : > { %p805_p5 = pneg %p804_p0 }
  0x26   : > { %p812_p9 = pnand %p811_p7, %p805_p5 }
  0x28   : > { %815 = shalt.err (!%p812_p9)
}
  0x29   : > { %s918_s5 = smov 256   ;;  %s919_s6 = smov 16  }
  0x2a   : > { %667 = dma.hbm_to_vmem [thread:$0]  (!%p993_p11), %s1147_s2, 1024, %s145_s25, [#allocation6], %s918_s5, %s918_s5, %s919_s6  }
  0x2b   : > { %s1019_s9 = sadd.s32 1, %s912_s15   ;;  %s27_s11 = sadd.s32 1, %s908_s14 }
  0x2c   : > { %s24_s10 = ssub.s32 %s912_s15, %s1019_s9  ;;  %p34_p13 = scmp.ne.s32.totalorder %s908_s14, %s904_s13 }
  0x2d   : > { %p25_p12 = scmp.eq.s32.totalorder %s24_s10, 0  ;;  %p35_p0 = scmp.eq.s32.totalorder %s912_s15, 0 }
  0x2e   : > { %p1032_p10 = por %p106_p2, %p34_p13  ;;  %p678_p3 = scmp.lt.s32.totalorder %s912_s15, 2 }
  0x2f   : > { %s1028_s17 = scalar_select %p25_p12, %s908_s14, %s27_s11  }
  0x30   : > { %p36_p5 = por %p35_p0, %p34_p13  ;;  %s158_s22 = sand.u32 1, %s908_s14  }
  0x31   : > { %s1157_s21 = scalar_select %p1032_p10, 1, 0 }
  0x32   : > { %s576_s23 = sshll.u32 %s158_s22, 5  ;;  %s622_s24 = sshll.u32 %s912_s15, 9 }
  0x33   : > { %s1042_s29 = scalar_lea.hbm %s1145_s0, %s622_s24  ;;  %s162_s30 = scalar_lea.vmem [#allocation2], %s576_s23 }
  0x34   : > { %s170_s4 = sshll.u32 %s162_s30, 4  ;;  %p1046_p2 = pnand %p678_p3, %p36_p5  ;;  %s1044_s4 = int_to_ptr.vmem [resolvable:$true] %s170_s4 }
  0x35   : > { %s1050_s6 = scalar_lea.sflag [#allocation3], %s158_s22  ;;  %s816_s7 = scalar_lea.hbm %s1042_s29, 512 }
  0x36   : > { %p817_p11 = scmp.ne.s32.totalorder %s1042_s29, %s816_s7  ;;  %p818_p7 = pneg %p1046_p2 }
  0x37   : > { %s821_s11 = scalar_lea.hbm %s1145_s0, 1024  ;;  %p822_p13 = scmp.lt.s32.totalorder %s1042_s29, %s1145_s0 }
  0x38   : > { %p819_p9 = pnand %p818_p7, %p817_p11  ;;  %p823_p0 = scmp.lt.s32.totalorder %s821_s11, %s816_s7 }
  0x3a   : > { %p820_p12 = pneg %p819_p9  ;;  %p824_p5 = por %p823_p0, %p822_p13 }
  0x3c   : > { %p825_p3 = pnand %p824_p5, %p820_p12 }
  0x3e   : > { %828 = shalt.err (!%p825_p3)
}
  0x3f   : > { %s829_s22 = scalar_lea.vmem %s1044_s4, 512  ;;  %s920_s25 = smov [#allocation2]  }
  0x40   : > { %p830_p1 = scmp.ne.s32.totalorder %s1044_s4, %s829_s22  ;;  %s834_s26 = sshll.u32 %s920_s25, 4  ;;  %s835_s26 = int_to_ptr.vmem [resolvable:$false] %s834_s26 }
  0x41   : > { %s836_s30 = scalar_lea.vmem %s835_s26, 1024  ;;  %p837_p9 = scmp.lt.s32.totalorder %s1044_s4, %s835_s26 }
  0x42   : > { %p832_p6 = pnand %p830_p1, %p818_p7  ;;  %p838_p10 = scmp.lt.s32.totalorder %s836_s30, %s829_s22 }
  0x44   : > { %p833_p11 = pneg %p832_p6  ;;  %p839_p4 = por %p838_p10, %p837_p9 }
  0x46   : > { %p840_p8 = pnand %p839_p4, %p833_p11 }
  0x48   : > { %843 = shalt.err (!%p840_p8)
}
  0x49   : > { %671 = dma.hbm_to_vmem [thread:$0]  (!%p1046_p2), %s1042_s29, 512, %s1044_s4, %s1050_s6, %s916_s27, %s916_s27, %s917_s28  }
  0x4a   : > { %p1159_p1 = scmp.ne.s32.totalorder %s1155_s20, 0 }
  0x4b   : > { %s1077_s7 = sand.u32 (!%p1159_p1), 1, %s904_s13   ;;  %p1160_p4 = scmp.ne.s32.totalorder (!%p1159_p1), %s1153_s18, 0 }
  0x4c   : > { %182 = sbr.rel (%p1159_p1) target bundleno = 349 (0x15d), region = 32  ;;  %s581_s8 = sshll.u32 (!%p1159_p1), %s1077_s7, 5 }
  0x4d   : > { %s185_s10 = scalar_lea.sflag (!%p1159_p1), [#allocation3], %s1077_s7  ;;  %s1081_s11 = scalar_lea.vmem (!%p1159_p1), [#allocation2], %s581_s8 }
  0x51   : > { %887 = dma.done.wait (%p1160_p4), %s185_s10, 512  }
  0x52   : > { %889 = vsyncadd (%p1160_p4), %s185_s10, 4294966784  ;;  %p1161_p6 = scmp.eq.s32.totalorder %s965_s16, 0 }
  0x54   : > { %891 = dma.done.wait (%p1161_p6), [#allocation6], 4096   ;;  %p1162_p8 = pmov %p1161_p6 }
  0x55   : > { %v722_v0 = vld [vmem:[#allocation5 + $0x74] ss:$8 sps:$4 sm:$0xff]   ;;  %v724_v1 = vld [vmem:[#allocation5 + $0x70] ss:$8 sps:$4 sm:$0xff]   ;;  %v725_v2 = vld [vmem:[#allocation5 + $0x64] ss:$8 sps:$4 sm:$0xff]  }
  0x56   : > { %893 = vsyncadd (%p1162_p8), [#allocation6], 4294963200  ;;  %403 = vmatprep.subr.bf16.mxu0 %v722_v0  ;;  %625 = vmatprep.subr.bf16.mxu1 %v722_v0  ;;  %v727_v3 = vld [vmem:[#allocation5 + $0x60] ss:$8 sps:$4 sm:$0xff]   ;;  %v728_v4 = vld [vmem:[#allocation5 + $0x54] ss:$8 sps:$4 sm:$0xff]  }
  0x57   : > { %404 = vmatpush1.bf16.msra.mxu0 %v724_v1  ;;  %637 = vmatpush1.bf16.msra.mxu1 %v724_v1  ;;  %v730_v5 = vld [vmem:[#allocation5 + $0x50] ss:$8 sps:$4 sm:$0xff]   ;;  %v731_v6 = vld [vmem:[#allocation5 + $0x44] ss:$8 sps:$4 sm:$0xff]   ;;  %v733_v7 = vld [vmem:[#allocation5 + $0x40] ss:$8 sps:$4 sm:$0xff]  }
  0x58   : > { %405 = vmatprep.subr.bf16.mxu0 %v725_v2  ;;  %626 = vmatprep.subr.bf16.mxu1 %v725_v2  ;;  %v734_v8 = vld [vmem:[#allocation5 + $0x34] ss:$8 sps:$4 sm:$0xff]   ;;  %v736_v9 = vld [vmem:[#allocation5 + $0x30] ss:$8 sps:$4 sm:$0xff]   ;;  %v737_v10 = vld [vmem:[#allocation5 + $0x24] ss:$8 sps:$4 sm:$0xff]  }
  0x59   : > { %v760_v11 = vld [vmem:[%s1081_s11 + $0x4] ss:$8 sps:$4 sm:$0xff]   ;;  %vm396_vm0 = vcmask 523264   ;;  %v763_v12 = vld [vmem:[%s1081_s11 + $0x14] ss:$8 sps:$4 sm:$0xff]   ;;  %s584_s18 = sshll.u32 %s1077_s7, 6 }
  0x5a   : > { %v739_v13 = vld [vmem:[#allocation5 + $0x20] ss:$8 sps:$4 sm:$0xff]   ;;  %v740_v14 = vld [vmem:[#allocation5 + $0x14] ss:$8 sps:$4 sm:$0xff]   ;;  %613 = vmatprep.mubr.msk.bf16.mxu0 %vm396_vm0, %v760_v11  ;;  %614 = vmatprep.mubr.msk.bf16.mxu1 %vm396_vm0, %v763_v12  ;;  %v742_v15 = vld [vmem:[#allocation5 + $0x10] ss:$8 sps:$4 sm:$0xff]  }
  0x5b   : > { %406 = vmatpush1.bf16.msra.mxu0 %v727_v3  ;;  %638 = vmatpush1.bf16.msra.mxu1 %v727_v3  ;;  %v743_v16 = vld [vmem:[#allocation5 + $0x4] ss:$8 sps:$4 sm:$0xff]   ;;  %v745_v17 = vld [vmem:[#allocation5] ss:$8 sps:$4 sm:$0xff]   ;;  %v746_v18 = vld [vmem:[#allocation5 + $0xb4] ss:$8 sps:$4 sm:$0xff]  }
  0x5c   : > { %407 = vmatprep.subr.bf16.mxu0 %v728_v4  ;;  %627 = vmatprep.subr.bf16.mxu1 %v728_v4  ;;  %v748_v19 = vld [vmem:[#allocation5 + $0xb0] ss:$8 sps:$4 sm:$0xff]   ;;  %v749_v20 = vld [vmem:[#allocation5 + $0xa4] ss:$8 sps:$4 sm:$0xff]   ;;  %v751_v21 = vld [vmem:[#allocation5 + $0xa0] ss:$8 sps:$4 sm:$0xff]  }
  0x5d   : > { %v752_v22 = vld [vmem:[#allocation5 + $0x94] ss:$8 sps:$4 sm:$0xff]   ;;  %v754_v23 = vld [vmem:[#allocation5 + $0x90] ss:$8 sps:$4 sm:$0xff]   ;;  %v755_v24 = vld [vmem:[#allocation5 + $0x84] ss:$8 sps:$4 sm:$0xff]  }
  0x5e   : > { %v757_v25 = vld [vmem:[#allocation5 + $0x80] ss:$8 sps:$4 sm:$0xff]   ;;  %v761_v27 = vld [vmem:[%s1081_s11 + $0x10] ss:$8 sps:$4 sm:$0xff]   ;;  %s218_s20 = scalar_lea.vmem [#allocation8], %s584_s18  ;;  %s624_s28 = sshll.u32 %s965_s16, 10 }
  0x5f   : > { %408 = vmatpush1.bf16.msra.mxu0 %v730_v5  ;;  %639 = vmatpush1.bf16.msra.mxu1 %v730_v5  ;;  %v758_v26 = vld [vmem:[%s1081_s11] ss:$8 sps:$4 sm:$0xff]   ;;  %s479_s27 = sshll.u32 %s218_s20, 4  ;;  %v252_v38 = vld [vmem:[#allocation7 + $0x10] sm:$0xff]  ;;  %v253_v44 = vld [vmem:[#allocation7 + $0x18] sm:$0xff]  ;;  %s1102_s16 = scalar_lea.hbm %s1148_s3, %s624_s28  ;;  %s1097_s27 = int_to_ptr.vmem [resolvable:$true] %s479_s27 }
  0x60   : > { %409 = vmatprep.subr.bf16.mxu0 %v731_v6  ;;  %628 = vmatprep.subr.bf16.mxu1 %v731_v6  ;;  %v250_v28 = vld [vmem:[#allocation7] sm:$0xff]  ;;  %v251_v32 = vld [vmem:[#allocation7 + $0x8] sm:$0xff]  ;;  %v256_v39 = vld [vmem:[#allocation7 + $0x30] sm:$0xff]  ;;  %s465_s5 = scalar_lea.sflag [#allocation4], %s1077_s7  ;;  %s844_s6 = scalar_lea.vmem %s1097_s27, 1024 }
  0x61   : > { %v254_v29 = vld [vmem:[#allocation7 + $0x20] sm:$0xff]  ;;  %v255_v33 = vld [vmem:[#allocation7 + $0x28] sm:$0xff]  ;;  %v257_v45 = vld [vmem:[#allocation7 + $0x38] sm:$0xff]  ;;  %p845_p10 = scmp.ne.s32.totalorder %s1097_s27, %s844_s6  ;;  %p1163_p2 = scmp.ne.s32.totalorder %s1157_s21, 0 }
  0x62   : > { %s921_s23 = smov [#allocation8]  }
  0x63   : > { %410 = vmatpush1.bf16.msra.mxu0 %v733_v7  ;;  %640 = vmatpush1.bf16.msra.mxu1 %v733_v7  ;;  %p846_p7 = pnand %p845_p10, %p1163_p2  ;;  %s848_s24 = sshll.u32 %s921_s23, 4  ;;  %s849_s24 = int_to_ptr.vmem [resolvable:$false] %s848_s24 }
  0x64   : > { %411 = vmatprep.subr.bf16.mxu0 %v734_v8  ;;  %629 = vmatprep.subr.bf16.mxu1 %v734_v8  ;;  %s850_s22 = scalar_lea.vmem %s849_s24, 2048  ;;  %p851_p13 = scmp.lt.s32.totalorder %s1097_s27, %s849_s24 }
  0x65   : > { %p847_p12 = pneg %p846_p7  ;;  %p852_p0 = scmp.lt.s32.totalorder %s850_s22, %s844_s6 }
  0x67   : > { %412 = vmatpush1.bf16.msra.mxu0 %v736_v9  ;;  %641 = vmatpush1.bf16.msra.mxu1 %v736_v9  ;;  %p853_p5 = por %p852_p0, %p851_p13 }
  0x68   : > { %413 = vmatprep.subr.bf16.mxu0 %v737_v10  ;;  %630 = vmatprep.subr.bf16.mxu1 %v737_v10 }
  0x69   : > { %p854_p3 = pnand %p853_p5, %p847_p12 }
  0x6b   : > { %414 = vmatpush1.bf16.msra.mxu0 %v739_v13  ;;  %642 = vmatpush1.bf16.msra.mxu1 %v739_v13 }
  0x6c   : > { %415 = vmatprep.subr.bf16.mxu0 %v740_v14  ;;  %631 = vmatprep.subr.bf16.mxu1 %v740_v14 }
  0x6f   : > { %416 = vmatpush1.bf16.msra.mxu0 %v742_v15  ;;  %643 = vmatpush1.bf16.msra.mxu1 %v742_v15 }
  0x70   : > { %417 = vmatprep.subr.bf16.mxu0 %v743_v16  ;;  %632 = vmatprep.subr.bf16.mxu1 %v743_v16 }
  0x73   : > { %418 = vmatpush1.bf16.msra.mxu0 %v745_v17  ;;  %644 = vmatpush1.bf16.msra.mxu1 %v745_v17 }
  0x74   : > { %427 = vmatprep.subr.bf16.mxu0 %v746_v18  ;;  %633 = vmatprep.subr.bf16.mxu1 %v746_v18 }
  0x77   : > { %428 = vmatpush2.bf16.msra.mxu0 %v748_v19  ;;  %645 = vmatpush2.bf16.msra.mxu1 %v748_v19 }
  0x78   : > { %429 = vmatprep.subr.bf16.mxu0 %v749_v20  ;;  %634 = vmatprep.subr.bf16.mxu1 %v749_v20 }
  0x7b   : > { %430 = vmatpush2.bf16.msra.mxu0 %v751_v21  ;;  %646 = vmatpush2.bf16.msra.mxu1 %v751_v21 }
  0x7c   : > { %431 = vmatprep.subr.bf16.mxu0 %v752_v22  ;;  %635 = vmatprep.subr.bf16.mxu1 %v752_v22 }
  0x7f   : > { %432 = vmatpush2.bf16.msra.mxu0 %v754_v23  ;;  %647 = vmatpush2.bf16.msra.mxu1 %v754_v23 }
  0x80   : > { %433 = vmatprep.subr.bf16.mxu0 %v755_v24  ;;  %636 = vmatprep.subr.bf16.mxu1 %v755_v24 }
  0x83   : > { %434 = vmatpush2.bf16.msra.mxu0 %v757_v25  ;;  %648 = vmatpush2.bf16.msra.mxu1 %v757_v25 }
  0x86   : > { %436 = vmatmul.mubr.bf16.vlgmr.msra.gmra.mxu0 %v758_v26  ;;  %446 = vmatmul.mubr.bf16.vlgmr.msra.gmra.mxu1 %v761_v27 }
 0x146   : > { %v437_v30 = vpop.f32.mrf.mxu0  ;;  %v447_v31 = vpop.f32.mrf.mxu1 }
 0x147   : > { %v438_v34 = vadd.f32 %v437_v30, %v250_v28  ;;  %v448_v35 = vadd.f32 %v447_v31, %v254_v29 }
 0x148   : > { %v439_v36 = vpop.f32.mrf.mxu0  ;;  %v449_v37 = vpop.f32.mrf.mxu1 }
 0x149   : > { %456 = vst [vmem:[%s218_s20] sm:$0xff] %v438_v34  ;;  %460 = vst [vmem:[%s218_s20 + $0x20] sm:$0xff] %v448_v35  ;;  %v440_v40 = vadd.f32 %v439_v36, %v251_v32  ;;  %v450_v41 = vadd.f32 %v449_v37, %v255_v33 }
 0x14a   : > { %v441_v42 = vpop.f32.mrf.mxu0  ;;  %v451_v43 = vpop.f32.mrf.mxu1 }
 0x14b   : > { %457 = vst [vmem:[%s218_s20 + $0x8] sm:$0xff] %v440_v40  ;;  %461 = vst [vmem:[%s218_s20 + $0x28] sm:$0xff] %v450_v41  ;;  %v442_v46 = vadd.f32 %v441_v42, %v252_v38  ;;  %v452_v47 = vadd.f32 %v451_v43, %v256_v39 }
 0x14c   : > { %v443_v48 = vpop.f32.mrf.mxu0  ;;  %v453_v49 = vpop.f32.mrf.mxu1 }
 0x14d   : > { %458 = vst [vmem:[%s218_s20 + $0x10] sm:$0xff] %v442_v46  ;;  %462 = vst [vmem:[%s218_s20 + $0x30] sm:$0xff] %v452_v47  ;;  %v444_v50 = vadd.f32 %v443_v48, %v253_v44  ;;  %v454_v51 = vadd.f32 %v453_v49, %v257_v45 }
 0x14f   : > { %459 = vst [vmem:[%s218_s20 + $0x18] sm:$0xff] %v444_v50  ;;  %463 = vst [vmem:[%s218_s20 + $0x38] sm:$0xff] %v454_v51 }
 0x150   : > { %857 = shalt.err (!%p854_p3)
}
 0x151   : > { %s858_s25 = scalar_lea.hbm %s1102_s16, 1024  ;;  %s862_s8 = scalar_lea.hbm %s1148_s3, 2048 }
 0x152   : > { %p859_p11 = scmp.ne.s32.totalorder %s1102_s16, %s858_s25  ;;  %p863_p4 = scmp.lt.s32.totalorder %s1102_s16, %s1148_s3 }
 0x153   : > { %p864_p6 = scmp.lt.s32.totalorder %s862_s8, %s858_s25 }
 0x154   : > { %p860_p9 = pnand %p859_p11, %p1163_p2 }
 0x155   : > { %p865_p8 = por %p864_p6, %p863_p4 }
 0x156   : > { %p861_p1 = pneg %p860_p9 }
 0x158   : > { %p866_p10 = pnand %p865_p8, %p861_p1 }
 0x15a   : > { %869 = shalt.err (!%p866_p10)
}
 0x15b   : > { %s922_s18 = smov 256   ;;  %s923_s20 = smov 16  }
 0x15c   : > { %659 = dma.vmem_to_hbm [thread:$0]  (%p1163_p2), %s1097_s27, 1024, %s1102_s16, %s465_s5, %s922_s18, %s922_s18, %s923_s20  }
 0x15d PF: > { %s494_s28 = sand.u32 1, %s900_s12   ;;  %p1164_p7 = scmp.ne.s32.totalorder %s1154_s19, 0 }
 0x15e   : > { %p1165_p12 = scmp.ge.s32.totalorder %s912_s15, 2  ;;  %s495_s29 = scalar_lea.sflag [#allocation4], %s494_s28 }
 0x160   : > { %p673_p13 = pnand %p1165_p12, %p1164_p7 }
 0x162   : > { %p674_p0 = pneg %p673_p13 }
 0x164   : > { %895 = dma.done.wait (%p674_p0), %s495_s29, 1024  }
 0x165   : > { %897 = vsyncadd (%p674_p0), %s495_s29, 4294966272  ;;  %p17_p5 = scmp.ge.s32.totalorder %s1019_s9, 4   ;;  %s1166_s12 = smov %s904_s13 }
 0x166   : > { %s1167_s13 = smov %s908_s14  ;;  %s1168_s14 = smov %s1028_s17 }
 0x167   : > { %s1169_s15 = smov %s1019_s9  ;;  %19 = sbr.rel (!%p17_p5) target bundleno = 6 (0x6), region = 85 }
 0x16c   :  { %500 = vsyncpa [#allocation3], 1 }
 0x16d   :  { %502 = vsyncpa [#allocation3 + $0x1], 1 }
 0x16e   :  { %503 = vsyncpa [#allocation6], 1 }
 0x16f   :  { %504 = vsyncpa [#allocation4], 1 }
 0x170   :  { %506 = vsyncpa [#allocation4 + $0x1], 1 }

</bundles_post_ra>
